<compile_context>
chip_gen: v7x
topology: tpu7x:2x2x1
jax: 0.10.0
libtpu: 0.0.40
codegen_flags: <defaults>
</compile_context>

<pallas_src>
import functools

import jax
import jax.numpy as jnp
from jax import lax
from jax.experimental import pallas as pl
from jax.experimental.pallas import tpu as pltpu

ALPHA = 0.25
GAMMA = 1.0

LANES = 128
MAX_TILE_ROWS = 2048   # 2048*128*4 B = 1 MiB per f32 input block
NCORES = 2             # leading parallel grid axis (v7x megacore; no-op elsewhere)


def _round_up(x, m):
    return ((x + m - 1) // m) * m


def _focal_loss_kernel(x_ref, t_ref, acc_ref, *, alpha, gamma, n_total,
                       tile_rows, has_pad):
    c = pl.program_id(0)
    s = pl.program_id(1)

    @pl.when(s == 0)
    def _():
        acc_ref[...] = jnp.zeros_like(acc_ref)

    x = x_ref[...].astype(jnp.float32)
    t = t_ref[...].astype(jnp.float32)

    # Numerically-stable BCE-with-logits (matches F.binary_cross_entropy_with_logits):
    #   bce = max(x, 0) - x*t + log(1 + exp(-|x|))
    bce = jnp.maximum(x, 0.0) - x * t + jnp.log1p(jnp.exp(-jnp.abs(x)))
    pt = jnp.exp(-bce)
    one_minus_pt = 1.0 - pt

    # Trace-time specialization of the focal modulation (avoids pow -> exp/log).
    if gamma == 1.0:
        mod = one_minus_pt
    elif gamma == 2.0:
        mod = one_minus_pt * one_minus_pt
    elif gamma == 0.0:
        mod = jnp.ones_like(one_minus_pt)
    else:
        # Clamp to avoid NaN from tiny negative rounding with non-integer gamma.
        mod = jnp.power(jnp.maximum(one_minus_pt, 0.0), gamma)

    loss = alpha * mod * bce

    if has_pad:
        # Zero out contributions from zero-padded tail elements.
        row = lax.broadcasted_iota(jnp.int32, loss.shape, 0)
        lane = lax.broadcasted_iota(jnp.int32, loss.shape, 1)
        base_row = (c * pl.num_programs(1) + s) * tile_rows
        flat_idx = (base_row + row) * LANES + lane
        loss = jnp.where(flat_idx < n_total, loss, 0.0)

    # Reduce the (tile_rows, 128) block into the resident (8, 128) accumulator
    # with pure VPU vector adds (no per-step XLU / masked scalar store).
    acc_ref[...] += jnp.sum(loss.reshape(tile_rows // 8, 8, LANES), axis=0)


def focal_loss(inputs, targets, alpha=ALPHA, gamma=GAMMA):
    """Pallas TPU focal loss. `inputs` are logits; `targets` same shape, in [0, 1]."""
    assert inputs.shape == targets.shape
    n_total = int(inputs.size)

    rows = (n_total + LANES - 1) // LANES
    tile_rows = min(MAX_TILE_ROWS, _round_up(rows, 8))
    rows_padded = _round_up(rows, NCORES * tile_rows)
    steps = rows_padded // (NCORES * tile_rows)
    pad = rows_padded * LANES - n_total

    x_flat = inputs.reshape(-1)
    t_flat = targets.reshape(-1)
    if pad:
        x_flat = jnp.pad(x_flat, (0, pad))
        t_flat = jnp.pad(t_flat, (0, pad))
    x2 = x_flat.reshape(rows_padded, LANES)
    t2 = t_flat.reshape(rows_padded, LANES)

    kernel = functools.partial(
        _focal_loss_kernel,
        alpha=float(alpha), gamma=float(gamma),
        n_total=n_total, tile_rows=tile_rows, has_pad=pad > 0)

    in_map = lambda c, s: (c * steps + s, 0)

    partials = pl.pallas_call(
        kernel,
        out_shape=jax.ShapeDtypeStruct((NCORES * 8, LANES), jnp.float32),
        grid_spec=pltpu.PrefetchScalarGridSpec(
            num_scalar_prefetch=0,
            grid=(NCORES, steps),
            in_specs=[
                pl.BlockSpec((tile_rows, LANES), in_map),
                pl.BlockSpec((tile_rows, LANES), in_map),
            ],
            # Per-core (8,128) partial-sum block, resident across the reduction axis.
            out_specs=pl.BlockSpec((8, LANES), lambda c, s: (c, 0)),
        ),
        compiler_params=pltpu.CompilerParams(
            dimension_semantics=("parallel", "arbitrary")),
    )(x2, t2)

    return jnp.sum(partials) / n_total


def _focal_loss_ref(inputs, targets, alpha=ALPHA, gamma=GAMMA):
    x = inputs.astype(jnp.float32)
    t = targets.astype(jnp.float32)
    bce = jnp.maximum(x, 0.0) - x * t + jnp.log1p(jnp.exp(-jnp.abs(x)))
    pt = jnp.exp(-bce)
    return jnp.mean(alpha * (1.0 - pt) ** gamma * bce)


if __name__ == "__main__":
    key = jax.random.PRNGKey(0)
    k1, k2 = jax.random.split(key)

    # Small NCHW-style logits and binary targets.
    x = jax.random.normal(k1, (2, 4, 16, 16), dtype=jnp.float32)
    targets = jax.random.bernoulli(k2, p=0.3, shape=(2, 4, 16, 16)).astype(jnp.float32)

    loss = focal_loss(x, targets)
    jax.block_until_ready(loss)

    ref = _focal_loss_ref(x, targets)
    assert jnp.allclose(loss, ref, rtol=1e-5, atol=1e-6), (loss, ref)

    # Also exercise a larger / non-aligned size and a non-special gamma path.
    k3, k4 = jax.random.split(k2)
    x2 = jax.random.normal(k3, (3, 5, 33, 17), dtype=jnp.float32)
    t2 = jax.random.bernoulli(k4, p=0.5, shape=x2.shape).astype(jnp.float32)
    loss2 = focal_loss(x2, t2, alpha=0.5, gamma=2.0)
    jax.block_until_ready(loss2)
    ref2 = _focal_loss_ref(x2, t2, alpha=0.5, gamma=2.0)
    assert jnp.allclose(loss2, ref2, rtol=1e-5, atol=1e-6), (loss2, ref2)

    print("KERNEL_OK")
</pallas_src>

<mosaic_0001>
module attributes {stable_mosaic.version = 11 : i64} {
  func.func @_focal_loss_kernel(%arg0: i32, %arg1: i32, %arg2: memref<16x128xf32, #tpu.memory_space<vmem>>, %arg3: memref<16x128xf32, #tpu.memory_space<vmem>>, %arg4: memref<8x128xf32, #tpu.memory_space<vmem>>) attributes {dimension_semantics = [#tpu.dimension_semantics<parallel>, #tpu.dimension_semantics<arbitrary>], iteration_bounds = array<i64: 2, 1>, scalar_prefetch = 0 : i64, scratch_operands = 0 : i64, tpu.core_type = #tpu.core_type<tc>, window_params = [{transform_indices = @transform_0, window_bounds = array<i64: 16, 128>}, {transform_indices = @transform_1, window_bounds = array<i64: 16, 128>}, {transform_indices = @transform_2, window_bounds = array<i64: 8, 128>}]} {
    %c0_i32 = arith.constant 0 : i32
    %0 = arith.cmpi eq, %arg1, %c0_i32 : i32
    %1 = arith.extui %0 : i1 to i32
    %c0_i32_0 = arith.constant 0 : i32
    %2 = arith.cmpi ne, %1, %c0_i32_0 : i32
    scf.if %2 {
      %cst_14 = arith.constant 0.000000e+00 : f32
      %42 = vector.broadcast %cst_14 : f32 to vector<8x128xf32>
      %c0_15 = arith.constant 0 : index
      %c0_16 = arith.constant 0 : index
      %43 = vector.load %arg4[%c0_15, %c0_16] : memref<8x128xf32, #tpu.memory_space<vmem>>, vector<8x128xf32>
      tpu.vector_store %arg4[%c0_15, %c0_16], %42 {strides = array<i32>} : memref<8x128xf32, #tpu.memory_space<vmem>>, vector<8x128xf32>,
    } else {
    }
    %c0 = arith.constant 0 : index
    %c0_1 = arith.constant 0 : index
    %3 = vector.load %arg2[%c0, %c0_1] : memref<16x128xf32, #tpu.memory_space<vmem>>, vector<16x128xf32>
    %c0_2 = arith.constant 0 : index
    %c0_3 = arith.constant 0 : index
    %4 = vector.load %arg3[%c0_2, %c0_3] : memref<16x128xf32, #tpu.memory_space<vmem>>, vector<16x128xf32>
    %cst = arith.constant 0.000000e+00 : f32
    %5 = vector.broadcast %cst : f32 to vector<16x128xf32>
    %6 = arith.maximumf %3, %5 : vector<16x128xf32>
    %7 = arith.mulf %3, %4 : vector<16x128xf32>
    %8 = arith.subf %6, %7 : vector<16x128xf32>
    %9 = math.absf %3 : vector<16x128xf32>
    %cst_4 = arith.constant 0.000000e+00 : f32
    %10 = vector.broadcast %cst_4 : f32 to vector<16x128xf32>
    %11 = arith.subf %10, %9 : vector<16x128xf32>
    %12 = math.exp %11 : vector<16x128xf32>
    %13 = math.log1p %12 : vector<16x128xf32>
    %14 = arith.addf %8, %13 : vector<16x128xf32>
    %cst_5 = arith.constant 0.000000e+00 : f32
    %15 = vector.broadcast %cst_5 : f32 to vector<16x128xf32>
    %16 = arith.subf %15, %14 : vector<16x128xf32>
    %17 = math.exp %16 : vector<16x128xf32>
    %cst_6 = arith.constant 1.000000e+00 : f32
    %18 = vector.broadcast %cst_6 : f32 to vector<16x128xf32>
    %19 = arith.subf %18, %17 : vector<16x128xf32>
    %cst_7 = arith.constant 2.500000e-01 : f32
    %20 = vector.broadcast %cst_7 : f32 to vector<16x128xf32>
    %21 = arith.mulf %20, %19 : vector<16x128xf32>
    %22 = arith.mulf %21, %14 : vector<16x128xf32>
    %23 = tpu.iota {dimensions = array<i32: 0>} : vector<16x128xi32>
    %24 = tpu.iota {dimensions = array<i32: 1>} : vector<16x128xi32>
    %c1_i32 = arith.constant 1 : i32
    %25 = arith.muli %arg0, %c1_i32 : i32
    %26 = arith.addi %25, %arg1 : i32
    %c16_i32 = arith.constant 16 : i32
    %27 = arith.muli %26, %c16_i32 : i32
    %28 = vector.broadcast %27 : i32 to vector<16x128xi32>
    %29 = arith.addi %28, %23 : vector<16x128xi32>
    %c128_i32 = arith.constant 128 : i32
    %30 = vector.broadcast %c128_i32 : i32 to vector<16x128xi32>
    %31 = arith.muli %29, %30 : vector<16x128xi32>
    %32 = arith.addi %31, %24 : vector<16x128xi32>
    %c2048_i32 = arith.constant 2048 : i32
    %33 = vector.broadcast %c2048_i32 : i32 to vector<16x128xi32>
    %34 = arith.cmpi slt, %32, %33 : vector<16x128xi32>
    %cst_8 = arith.constant 0.000000e+00 : f32
    %35 = vector.broadcast %cst_8 : f32 to vector<16x128xf32>
    %36 = arith.select %34, %22, %35 : vector<16x128xi1>, vector<16x128xf32>
    %c0_9 = arith.constant 0 : index
    %c0_10 = arith.constant 0 : index
    %37 = vector.load %arg4[%c0_9, %c0_10] : memref<8x128xf32, #tpu.memory_space<vmem>>, vector<8x128xf32>
    %38 = vector.shape_cast %36 : vector<16x128xf32> to vector<2x8x128xf32>
    %cst_11 = arith.constant dense<0.000000e+00> : vector<8x128xf32>
    %39 = vector.multi_reduction <add>, %38, %cst_11 [0] : vector<2x8x128xf32> to vector<8x128xf32>
    %40 = arith.addf %37, %39 : vector<8x128xf32>
    %c0_12 = arith.constant 0 : index
    %c0_13 = arith.constant 0 : index
    %41 = vector.load %arg4[%c0_12, %c0_13] : memref<8x128xf32, #tpu.memory_space<vmem>>, vector<8x128xf32>
    tpu.vector_store %arg4[%c0_12, %c0_13], %40 {strides = array<i32>} : memref<8x128xf32, #tpu.memory_space<vmem>>, vector<8x128xf32>,
    return
  }
  func.func @transform_0(%arg0: i32, %arg1: i32) -> (i32, i32) {
    %c1_i32 = arith.constant 1 : i32
    %0 = arith.muli %arg0, %c1_i32 : i32
    %1 = arith.addi %0, %arg1 : i32
    %c0_i32 = arith.constant 0 : i32
    %c0_i32_0 = arith.constant 0 : i32
    return %1, %c0_i32 : i32, i32
  }
  func.func @transform_1(%arg0: i32, %arg1: i32) -> (i32, i32) {
    %c1_i32 = arith.constant 1 : i32
    %0 = arith.muli %arg0, %c1_i32 : i32
    %1 = arith.addi %0, %arg1 : i32
    %c0_i32 = arith.constant 0 : i32
    %c0_i32_0 = arith.constant 0 : i32
    return %1, %c0_i32 : i32, i32
  }
  func.func @transform_2(%arg0: i32, %arg1: i32) -> (i32, i32) {
    %c0_i32 = arith.constant 0 : i32
    %c0_i32_0 = arith.constant 0 : i32
    return %arg0, %c0_i32 : i32, i32
  }
}

</mosaic_0001>

<bundles_post_ra>
// kernel: tpu_custom_call.1
= control target key start
LH: loop header
LB: loop body
LE: loop exit
PB: predicated region body
PF: predicated region fallthrough
CT: control target
= control target key end

     0   :  { %7 = vsyncpa [#allocation3], 0  ;;  %s925_s0 = inlined_call_operand.hbm [shape: f32[32,128], index: 0, kind: input, shape index: {}]   ;;  %s926_s1 = inlined_call_operand.hbm [shape: f32[32,128], index: 1, kind: input, shape index: {}]   ;;  %s927_s2 = inlined_call_operand.hbm [shape: f32[16,128], index: 2, kind: output, shape index: {}]  }
   0x1   :  { %9 = vsyncpa [#allocation3 + $0x1], 0 }
   0x2   :  { %10 = vsyncpa [#allocation6], 0 }
   0x3   :  { %12 = vsyncpa [#allocation6 + $0x1], 0 }
   0x4   :  { %13 = vsyncpa [#allocation4], 0 }
   0x5   :  { %15 = vsyncpa [#allocation4 + $0x1], 0  ;;  %s689_s9 = smov 0   ;;  %s691_s10 = smov 0  }
   0x6   :  { %s693_s11 = smov 0   ;;  %s695_s12 = smov 0  }
   0x7   :  { %s697_s13 = smov 0   ;;  %s699_s14 = smov 0  }
   0x8 LB: > { %s418_s15 = sadd.s32 4294967295, %s667_s14   ;;  %s419_s16 = sadd.s32 4294967294, %s667_s14   ;;  %s667_s14 = sphi %s699_s14, %s21_s14   ;;  %s663_s13 = sphi %s697_s13, %s945_s13   ;;  %s659_s12 = sphi %s695_s12, %s944_s12   ;;  %s655_s11 = sphi %s693_s11, %s943_s11   ;;  %s651_s10 = sphi %s691_s10, %s942_s10   ;;  %s647_s9 = sphi %s689_s9, %s941_s9  }
   0x9   : > { %s33_s17 = sadd.s32 1, %s663_s13  ;;  %s42_s18 = sadd.s32 1, %s655_s11 }
   0xa   : > { %p35_p0 = scmp.ge.s32.totalorder %s33_s17, 2  ;;  %p49_p1 = scmp.ne.s32.totalorder %s655_s11, %s651_s10 }
   0xb   : > { %p50_p2 = scmp.eq.s32.totalorder %s667_s14, 0  ;;  %p55_p3 = scmp.ne.s32.totalorder %s651_s10, %s647_s9 }
   0xc   : > { %s947_s17 = smov (%p35_p0, %s33_s17), 0  ;;  %p56_p5 = scmp.eq.s32.totalorder %s418_s15, 0 }
   0xd   : > { %p730_p4 = por %p50_p2, %p49_p1  ;;  %s39_s20 = ssub.s32 %s663_s13, %s947_s17 }
   0xe   : > { %p107_p6 = scmp.eq.s32.totalorder %s418_s15, 1  ;;  %p40_p7 = scmp.eq.s32.totalorder %s39_s20, 0 }
   0xf   : > { %p736_p8 = por %p56_p5, %p55_p3  ;;  %p113_p10 = scmp.eq.s32.totalorder %s419_s16, 1 }
  0x10   : > { %p740_p9 = por %p107_p6, %p49_p1  ;;  %p456_p13 = scmp.lt.s32.totalorder %s667_s14, 2 }
  0x11   : > { %s931_s21 = scalar_select %p736_p8, 1, 0 }
  0x12   : > { %s932_s22 = scalar_select %p740_p9, 1, 0 }
  0x13   : > { %s745_s23 = scalar_select %p40_p7, %s655_s11, %s42_s18  }
  0x14   : > { %p747_p11 = por %p113_p10, %p55_p3  ;;  %s754_s25 = sand.u32 1, %s655_s11  }
  0x15   : > { %s422_s26 = sshll.u32 %s754_s25, 4  ;;  %s437_s27 = sshll.u32 %s663_s13, 8 }
  0x16   : > { %s933_s24 = scalar_select %p747_p11, 1, 0 }
  0x17   : > { %s763_s30 = scalar_lea.hbm %s925_s0, %s437_s27  ;;  %s137_s3 = scalar_lea.vmem [#allocation2], %s422_s26 }
  0x18   : > { %s145_s4 = sshll.u32 %s137_s3, 4  ;;  %p771_p0 = pnand %p456_p13, %p730_p4  ;;  %s767_s4 = int_to_ptr.vmem [resolvable:$true] %s145_s4 }
  0x19   : > { %s134_s6 = scalar_lea.sflag [#allocation3], %s754_s25  ;;  %s521_s7 = scalar_lea.hbm %s763_s30, 256 }
  0x1a   : > { %p522_p2 = scmp.ne.s32.totalorder %s763_s30, %s521_s7  ;;  %p523_p3 = pneg %p771_p0 }
  0x1b   : > { %s526_s16 = scalar_lea.hbm %s925_s0, 512  ;;  %p527_p4 = scmp.lt.u32.totalorder %s763_s30, %s925_s0 }
  0x1c   : > { %p524_p5 = pnand %p523_p3, %p522_p2  ;;  %p528_p7 = scmp.lt.u32.totalorder %s526_s16, %s521_s7 }
  0x1d   : > { %p530_p13 = scmp.lt.u32.totalorder %s521_s7, %s763_s30 }
  0x1e   : > { %p525_p6 = pneg %p524_p5  ;;  %p529_p10 = por %p528_p7, %p527_p4 }
  0x20   : > { %p531_p12 = por %p530_p13, %p529_p10 }
  0x22   : > { %p532_p1 = pnand %p531_p12, %p525_p6 }
  0x24   : > { %535 = shalt.err (!%p532_p1)
}
  0x25   : > { %s536_s20 = scalar_lea.vmem %s767_s4, 256  ;;  %s669_s28 = smov [#allocation2]  }
  0x26   : > { %p537_p2 = scmp.ne.s32.totalorder %s767_s4, %s536_s20  ;;  %s541_s29 = sshll.u32 %s669_s28, 4  ;;  %s542_s29 = int_to_ptr.vmem [resolvable:$false] %s541_s29 }
  0x27   : > { %s543_s3 = scalar_lea.vmem %s542_s29, 512  ;;  %p544_p9 = scmp.lt.s32.totalorder %s767_s4, %s542_s29 }
  0x28   : > { %p539_p5 = pnand %p537_p2, %p523_p3  ;;  %p545_p4 = scmp.lt.s32.totalorder %s543_s3, %s536_s20 }
  0x2a   : > { %p540_p11 = pneg %p539_p5  ;;  %p546_p7 = por %p545_p4, %p544_p9 }
  0x2c   : > { %p547_p10 = pnand %p546_p7, %p540_p11 }
  0x2e   : > { %550 = shalt.err (!%p547_p10)
}
  0x2f   : > { %s670_s7 = smov 128   ;;  %s671_s8 = smov 8  }
  0x30   : > { %448 = dma.hbm_to_vmem [thread:$0]  (!%p771_p0), %s763_s30, 256, %s767_s4, %s134_s6, %s670_s7, %s670_s7, %s671_s8  }
  0x31   : > { %p175_p9 = scmp.lt.s32.totalorder %s667_s14, 3  ;;  %s813_s18 = scalar_lea.hbm %s926_s1, %s437_s27 }
  0x32   : > { %p935_p11 = scmp.ge.s32.totalorder %s667_s14, 1  ;;  %s159_s20 = scalar_lea.vmem [#allocation5], %s422_s26 }
  0x33   : > { %s167_s28 = sshll.u32 %s159_s20, 4  ;;  %s156_s30 = scalar_lea.sflag [#allocation6], %s754_s25  ;;  %s823_s28 = int_to_ptr.vmem [resolvable:$true] %s167_s28 }
  0x34   : > { %p817_p12 = pnand %p935_p11, %p175_p9  ;;  %s551_s4 = scalar_lea.hbm %s813_s18, 256 }
  0x35   : > { %p552_p1 = scmp.ne.s32.totalorder %s813_s18, %s551_s4  ;;  %s556_s29 = scalar_lea.hbm %s926_s1, 512 }
  0x36   : > { %p557_p2 = scmp.lt.u32.totalorder %s813_s18, %s926_s1  ;;  %p558_p5 = scmp.lt.u32.totalorder %s556_s29, %s551_s4 }
  0x37   : > { %p554_p6 = pnand %p552_p1, %p523_p3  ;;  %p560_p7 = scmp.lt.u32.totalorder %s551_s4, %s813_s18 }
  0x38   : > { %p559_p4 = por %p558_p5, %p557_p2 }
  0x39   : > { %p555_p13 = pneg %p554_p6 }
  0x3a   : > { %p561_p10 = por %p560_p7, %p559_p4 }
  0x3c   : > { %p562_p9 = pnand %p561_p10, %p555_p13 }
  0x3e   : > { %565 = shalt.err (!%p562_p9)
}
  0x3f   : > { %s566_s26 = scalar_lea.vmem %s823_s28, 256  ;;  %s672_s16 = smov [#allocation5]  }
  0x40   : > { %p567_p11 = scmp.ne.s32.totalorder %s823_s28, %s566_s26  ;;  %s571_s20 = sshll.u32 %s672_s16, 4  ;;  %s572_s20 = int_to_ptr.vmem [resolvable:$false] %s571_s20 }
  0x41   : > { %s573_s27 = scalar_lea.vmem %s572_s20, 512  ;;  %p574_p8 = scmp.lt.s32.totalorder %s823_s28, %s572_s20 }
  0x42   : > { %p569_p1 = pnand %p567_p11, %p523_p3  ;;  %p575_p2 = scmp.lt.s32.totalorder %s573_s27, %s566_s26 }
  0x44   : > { %p570_p6 = pneg %p569_p1  ;;  %p576_p5 = por %p575_p2, %p574_p8 }
  0x46   : > { %p577_p4 = pnand %p576_p5, %p570_p6 }
  0x48   : > { %580 = shalt.err (!%p577_p4)
}
  0x49   : > { %451 = dma.hbm_to_vmem [thread:$0]  (!%p771_p0), %s813_s18, 256, %s823_s28, %s156_s30, %s670_s7, %s670_s7, %s671_s8  }
  0x4a   : > { %179 = sbr.rel (%p817_p12) target bundleno = 159 (0x9f), region = 28  ;;  %s857_s4 = sand.u32 (!%p817_p12), 1, %s651_s10  }
  0x4b   : > { %s429_s6 = sshll.u32 (!%p817_p12), %s857_s4, 4  ;;  %s182_s29 = scalar_lea.sflag (!%p817_p12), [#allocation3], %s857_s4 }
  0x4c   : > { %s185_s5 = scalar_lea.vmem (!%p817_p12), [#allocation2], %s429_s6  ;;  %p937_p8 = scmp.ne.s32.totalorder (!%p817_p12), %s931_s21, 0 }
  0x51   : > { %634 = dma.done.wait (%p937_p8), %s182_s29, 256  }
  0x52   : > { %636 = vsyncadd (%p937_p8), %s182_s29, 4294967040  ;;  %s191_s25 = scalar_lea.sflag [#allocation6], %s857_s4  ;;  %s194_s7 = scalar_lea.vmem [#allocation5], %s429_s6 }
  0x53   : > { %638 = dma.done.wait (%p937_p8), %s191_s25, 256  }
  0x54   : > { %640 = vsyncadd (%p937_p8), %s191_s25, 4294967040  ;;  %v229_v0 = vld [vmem:[%s185_s5] sm:$0xff]  ;;  %v230_v1 = vld [vmem:[%s185_s5 + $0x8] sm:$0xff]  ;;  %v279_v31 = vlaneseq  ;;  %s432_s21 = sshll.u32 %s659_s12, 4  ;;  %s431_s8 = sshll.u32 %s857_s4, 3 }
  0x55   : > { %v239_v2 = vand.u32 2147483647, %v229_v0  ;;  %v240_v3 = vand.u32 2147483647, %v230_v1  ;;  %v231_v14 = vld [vmem:[%s194_s7] sm:$0xff]  ;;  %v232_v15 = vld [vmem:[%s194_s7 + $0x8] sm:$0xff]  ;;  %v286_v43 = vstv %s432_s21 }
  0x56   : > { %v233_v17 = vmax.f32 %v229_v0, 0.0  ;;  %v235_v18 = vmul.f32 %v231_v14, %v229_v0  ;;  %v234_v21 = vmax.f32 %v230_v1, 0.0  ;;  %v236_v22 = vmul.f32 %v232_v15, %v230_v1  ;;  %s434_s18 = sshll.u32 %s659_s12, 7  ;;  %s219_s19 = scalar_lea.vmem [#allocation7], %s431_s8 }
  0x57   : > { %v241_v4 = vsub.f32 0.0, %v239_v2  ;;  %v242_v5 = vsub.f32 0.0, %v240_v3  ;;  %v280_v37 = vshrl.u32 %v279_v31, 7  ;;  %v283_v46 = vand.u32 127, %v279_v31  ;;  %s315_s28 = sshll.u32 %s219_s19, 4  ;;  %s876_s15 = scalar_lea.hbm %s927_s2, %s434_s18  ;;  %s878_s28 = int_to_ptr.vmem [resolvable:$true] %s315_s28 }
  0x58   : > { %v237_v26 = vsub.f32 %v233_v17, %v235_v18  ;;  %v238_v29 = vsub.f32 %v234_v21, %v236_v22  ;;  %s302_s26 = scalar_lea.sflag [#allocation4], %s857_s4  ;;  %s581_s16 = scalar_lea.vmem %s878_s28, 128 }
  0x59   : > { %v243_v6 = vmul.f32 1.442695, %v241_v4  ;;  %v245_v7 = vmul.f32 1.442695, %v242_v5  ;;  %v281_v42 = vadd.s32 8, %v280_v37  ;;  %v287_v44 = vadd.s32 %v286_v43, %v280_v37  ;;  %p582_p0 = scmp.ne.s32.totalorder %s878_s28, %s581_s16  ;;  %p938_p3 = scmp.ne.s32.totalorder %s932_s22, 0 }
  0x5a   : > { %s673_s12 = smov [#allocation7]  }
  0x5b   : > { %509 = vpow2.f32 %v243_v6  ;;  %v288_v45 = vadd.s32 %v286_v43, %v281_v42  ;;  %v289_v47 = vmul.u32 128, %v287_v44  ;;  %p583_p12 = pnand %p582_p0, %p938_p3  ;;  %s585_s20 = sshll.u32 %s673_s12, 4  ;;  %s586_s20 = int_to_ptr.vmem [resolvable:$false] %s585_s20 }
  0x5c   : > { %511 = vpow2.f32 %v245_v7  ;;  %s587_s27 = scalar_lea.vmem %s586_s20, 256  ;;  %p588_p7 = scmp.lt.s32.totalorder %s878_s28, %s586_s20 }
  0x5d   : > { %v290_v48 = vmul.u32 128, %v288_v45  ;;  %v291_v50 = vadd.s32 %v289_v47, %v283_v46  ;;  %p584_p13 = pneg %p583_p12  ;;  %p589_p10 = scmp.lt.s32.totalorder %s587_s27, %s581_s16 }
  0x5f   : > { %v292_v53 = vadd.s32 %v290_v48, %v283_v46  ;;  %vm293_vm2 = vcmp.lt.s32.totalorder %v291_v50, 2048  ;;  %p590_p9 = por %p589_p10, %p588_p7 }
  0x61   : > { %vm294_vm3 = vcmp.lt.s32.totalorder %v292_v53, 2048  ;;  %p591_p11 = pnand %p590_p9, %p584_p13 }
  0x65   : > { %v510_v8 = vpop.eup %509 }
  0x66   : > { %v512_v9 = vpop.eup %511  ;;  %v247_v10 = vadd.f32 1.0, %v510_v8  ;;  %v250_v12 = vmul.f32 -0.5, %v510_v8  ;;  %v253_v19 = vand.u32 2147483647, %v510_v8 }
  0x67   : > { %v256_v11 = vadd.f32 1.0, %v512_v9  ;;  %v259_v13 = vmul.f32 -0.5, %v512_v9  ;;  %v262_v23 = vand.u32 2147483647, %v512_v9 }
  0x68   : > { %513 = vlog2.f32 %v247_v10  ;;  %v251_v16 = vadd.f32 1.0, %v250_v12  ;;  %vm254_vm0 = vcmp.lt.f32.partialorder %v253_v19, 0.0004427343 }
  0x69   : > { %515 = vlog2.f32 %v256_v11  ;;  %v260_v20 = vadd.f32 1.0, %v259_v13  ;;  %vm263_vm1 = vcmp.lt.f32.partialorder %v262_v23, 0.0004427343 }
  0x6a   : > { %v252_v24 = vmul.f32 %v510_v8, %v251_v16 }
  0x6b   : > { %v261_v27 = vmul.f32 %v512_v9, %v260_v20 }
  0x72   : > { %v514_v25 = vpop.eup %513 }
  0x73   : > { %v516_v28 = vpop.eup %515  ;;  %v249_v30 = vmul.f32 0.6931472, %v514_v25 }
  0x74   : > { %v258_v32 = vmul.f32 0.6931472, %v516_v28 }
  0x75   : > { %v255_v33 = vsel %vm254_vm0, %v252_v24, %v249_v30 }
  0x76   : > { %v264_v34 = vsel %vm263_vm1, %v261_v27, %v258_v32  ;;  %v265_v35 = vadd.f32 %v255_v33, %v237_v26 }
  0x77   : > { %v266_v36 = vadd.f32 %v264_v34, %v238_v29 }
  0x78   : > { %v267_v38 = vsub.f32 0.0, %v265_v35 }
  0x79   : > { %v268_v39 = vsub.f32 0.0, %v266_v36 }
  0x7a   : > { %v269_v40 = vmul.f32 1.442695, %v267_v38 }
  0x7b   : > { %v271_v41 = vmul.f32 1.442695, %v268_v39 }
  0x7c   : > { %517 = vpow2.f32 %v269_v40 }
  0x7d   : > { %519 = vpow2.f32 %v271_v41 }
  0x86   : > { %v518_v49 = vpop.eup %517 }
  0x87   : > { %v520_v51 = vpop.eup %519  ;;  %v273_v52 = vsub.f32 1.0, %v518_v49 }
  0x88   : > { %v274_v54 = vsub.f32 1.0, %v520_v51 }
  0x89   : > { %v275_v55 = vmul.f32 0.25, %v273_v52 }
  0x8a   : > { %v276_v56 = vmul.f32 0.25, %v274_v54 }
  0x8b   : > { %v277_v57 = vmul.f32 %v275_v55, %v265_v35 }
  0x8c   : > { %v278_v58 = vmul.f32 %v276_v56, %v266_v36 }
  0x8d   : > { %v295_v59 = vsel %vm293_vm2, %v277_v57, 0.0 }
  0x8e   : > { %v296_v60 = vsel %vm294_vm3, %v278_v58, 0.0 }
  0x8f   : > { %v298_v61 = vadd.f32 %v296_v60, %v295_v59 }
  0x91   : > { %300 = vst [vmem:[%s219_s19] sm:$0xff] %v298_v61 }
  0x92   : > { %594 = shalt.err (!%p591_p11)
}
  0x93   : > { %s595_s4 = scalar_lea.hbm %s876_s15, 128  ;;  %s599_s5 = scalar_lea.hbm %s927_s2, 256 }
  0x94   : > { %p596_p1 = scmp.ne.s32.totalorder %s876_s15, %s595_s4  ;;  %p600_p5 = scmp.lt.u32.totalorder %s876_s15, %s927_s2 }
  0x95   : > { %p601_p4 = scmp.lt.u32.totalorder %s599_s5, %s595_s4  ;;  %p603_p0 = scmp.lt.u32.totalorder %s595_s4, %s876_s15 }
  0x96   : > { %p597_p6 = pnand %p596_p1, %p938_p3 }
  0x97   : > { %p602_p8 = por %p601_p4, %p600_p5 }
  0x98   : > { %p598_p2 = pneg %p597_p6 }
  0x99   : > { %p604_p12 = por %p603_p0, %p602_p8 }
  0x9b   : > { %p605_p13 = pnand %p604_p12, %p598_p2 }
  0x9d   : > { %608 = shalt.err (!%p605_p13)
}
  0x9e   : > { %443 = dma.vmem_to_hbm [thread:$0]  (%p938_p3), %s878_s28, 128, %s876_s15, %s302_s26  }
  0x9f PF: > { %s327_s21 = sand.u32 1, %s647_s9   ;;  %p939_p7 = scmp.ne.s32.totalorder %s933_s24, 0 }
  0xa0   : > { %p940_p10 = scmp.ge.s32.totalorder %s667_s14, 2  ;;  %s328_s8 = scalar_lea.sflag [#allocation4], %s327_s21 }
  0xa2   : > { %p453_p9 = pnand %p940_p10, %p939_p7 }
  0xa4   : > { %642 = dma.done.wait (!%p453_p9), %s328_s8, 128  }
  0xa5   : > { %644 = vsyncadd (!%p453_p9), %s328_s8, 4294967168  ;;  %s21_s14 = sadd.s32 1, %s667_s14   ;;  %s941_s9 = smov %s651_s10 }
  0xa6   : > { %p18_p11 = scmp.ge.s32.totalorder %s21_s14, 4   ;;  %s942_s10 = smov %s655_s11 }
  0xa7   : > { %s943_s11 = smov %s745_s23  ;;  %s944_s12 = smov %s663_s13 }
  0xa8   : > { %s945_s13 = smov %s947_s17  ;;  %20 = sbr.rel (!%p18_p11) target bundleno = 8 (0x8), region = 90 }
  0xaf   :  { %333 = vsyncpa [#allocation3], 1 }
  0xb0   :  { %335 = vsyncpa [#allocation3 + $0x1], 1 }
  0xb1   :  { %336 = vsyncpa [#allocation6], 1 }
  0xb2   :  { %338 = vsyncpa [#allocation6 + $0x1], 1 }
  0xb3   :  { %339 = vsyncpa [#allocation4], 1 }
  0xb4   :  { %341 = vsyncpa [#allocation4 + $0x1], 1 }

</bundles_post_ra>
